<compile_context>
chip_gen: v5e
topology: v5e:2x2
jax: 0.10.0
libtpu: 0.0.40
codegen_flags: <defaults>
</compile_context>

<pallas_src>
import functools
import math

import jax
import jax.numpy as jnp
import numpy as np
from jax.experimental import pallas as pl
from jax.experimental.pallas import tpu as pltpu

_LANE = 128


def _round_up(n, m):
    return ((n + m - 1) // m) * m


def policy_mlp_kernel(x_ref, w1_ref, b1_ref, w2_ref, b2_ref, w3_ref, b3_ref, o_ref):
    # fc1 + relu  (MXU matmul, f32 accumulation; operands may be bf16)
    x = x_ref[...].astype(w1_ref.dtype)
    h1 = jnp.dot(x, w1_ref[...], preferred_element_type=jnp.float32) + b1_ref[...]
    h1 = jnp.maximum(h1, 0.0)

    # fc2 + relu
    h2 = jnp.dot(h1.astype(w2_ref.dtype), w2_ref[...],
                 preferred_element_type=jnp.float32) + b2_ref[...]
    h2 = jnp.maximum(h2, 0.0)

    # fc3 (lane-padded to 128 cols; padded bias cols are -1e30 -> exp() == 0)
    logits = jnp.dot(h2.astype(w3_ref.dtype), w3_ref[...],
                     preferred_element_type=jnp.float32) + b3_ref[...]

    # numerically stable softmax over the full 128-lane vreg
    m = jnp.max(logits, axis=-1, keepdims=True)
    e = jnp.exp(logits - m)
    denom = jnp.sum(e, axis=-1, keepdims=True)
    o_ref[...] = (e / denom).astype(o_ref.dtype)


def _choose_tile(B, *, max_tile=512, split_threshold=128):
    """Pick (tm, b_pad): minimal padding, tm multiple of 8, even #tiles when splitting."""
    if B <= split_threshold:
        tm = _round_up(max(B, 8), 8)
        return tm, tm
    n_tiles = 2
    while math.ceil(B / n_tiles) > max_tile:
        n_tiles += 2
    tm = _round_up(math.ceil(B / n_tiles), 8)
    b_pad = _round_up(B, tm)
    return tm, b_pad


def prepare_params(params, matmul_dtype=jnp.float32):
    """One-shot padding/casting of parameters — call once, reuse for every forward."""
    w1, b1, w2, b2, w3, b3 = (params[k] for k in ("w1", "b1", "w2", "b2", "w3", "b3"))
    hidden = w1.shape[1]
    out_size = w3.shape[1]
    n_pad = _round_up(out_size, _LANE)
    # fc3: lane-dense output; padded logit columns get -1e30 bias so exp() underflows to 0.
    w3_p = jnp.zeros((hidden, n_pad), jnp.float32).at[:, :out_size].set(w3.astype(jnp.float32))
    b3_p = jnp.full((1, n_pad), -1e30, jnp.float32).at[:, :out_size].set(b3.astype(jnp.float32))
    return {
        "w1": w1.astype(matmul_dtype), "b1": b1.astype(jnp.float32),
        "w2": w2.astype(matmul_dtype), "b2": b2.astype(jnp.float32),
        "w3": w3_p, "b3": b3_p,  # fc3 kept in f32 to preserve the 1e-5 tolerance
    }


@functools.partial(jax.jit, static_argnames=("out_size",))
def policy_network_forward(x, padded_params, *, out_size):
    """x: (B, input_size) f32; padded_params: output of prepare_params()."""
    w1, b1, w2, b2, w3, b3 = (padded_params[k] for k in ("w1", "b1", "w2", "b2", "w3", "b3"))
    B, in_size = x.shape
    hidden = w1.shape[1]
    n_pad = w3.shape[1]

    tm, b_pad = _choose_tile(B)
    if b_pad != B:
        x_p = jnp.zeros((b_pad, in_size), x.dtype).at[:B].set(x)
    else:
        x_p = x

    grid = (b_pad // tm,)

    out = pl.pallas_call(
        policy_mlp_kernel,
        out_shape=jax.ShapeDtypeStruct((b_pad, n_pad), jnp.float32),
        grid=grid,
        in_specs=[
            # x: tiled over batch, feature dim left at its natural size (no K pad)
            pl.BlockSpec((tm, in_size), lambda i: (i, 0)),
            # weights / biases: single block, VMEM-resident across the grid
            pl.BlockSpec((in_size, hidden), lambda i: (0, 0)),
            pl.BlockSpec((1, hidden), lambda i: (0, 0)),
            pl.BlockSpec((hidden, hidden), lambda i: (0, 0)),
            pl.BlockSpec((1, hidden), lambda i: (0, 0)),
            pl.BlockSpec((hidden, n_pad), lambda i: (0, 0)),
            pl.BlockSpec((1, n_pad), lambda i: (0, 0)),
        ],
        out_specs=pl.BlockSpec((tm, n_pad), lambda i: (i, 0)),
        compiler_params=pltpu.CompilerParams(
            dimension_semantics=("parallel",),  # batch tiles shard across v7x's 2 TCs
        ),
    )(x_p, w1, b1, w2, b2, w3, b3)

    return out[:B, :out_size]


def init_params(key, input_size, output_size, hidden_size=128):
    """Deterministic init mimicking PyTorch nn.Linear default (uniform ±1/sqrt(fan_in))."""
    ks = jax.random.split(key, 6)

    def lin(kw, kb, fan_in, fan_out):
        bound = 1.0 / np.sqrt(fan_in)
        w = jax.random.uniform(kw, (fan_in, fan_out), jnp.float32, -bound, bound)
        b = jax.random.uniform(kb, (1, fan_out), jnp.float32, -bound, bound)
        return w, b

    w1, b1 = lin(ks[0], ks[1], input_size, hidden_size)
    w2, b2 = lin(ks[2], ks[3], hidden_size, hidden_size)
    w3, b3 = lin(ks[4], ks[5], hidden_size, output_size)
    return {"w1": w1, "b1": b1, "w2": w2, "b2": b2, "w3": w3, "b3": b3}


def reference_forward(x, p):
    h1 = jax.nn.relu(x @ p["w1"] + p["b1"])
    h2 = jax.nn.relu(h1 @ p["w2"] + p["b2"])
    return jax.nn.softmax(h2 @ p["w3"] + p["b3"], axis=-1)


if __name__ == "__main__":
    key = jax.random.PRNGKey(0)
    k_x, k_p = jax.random.split(key)

    batch = 8
    input_size = 32     # state vector size
    output_size = 4     # number of actions
    hidden_size = 128

    x = jax.random.normal(k_x, (batch, input_size), dtype=jnp.float32)
    params = init_params(k_p, input_size, output_size, hidden_size)
    padded = prepare_params(params)   # one-shot weight padding, hoisted out of forward

    probs = jax.block_until_ready(policy_network_forward(x, padded, out_size=output_size))
    ref = reference_forward(x, params)
    np.testing.assert_allclose(np.asarray(probs), np.asarray(ref), rtol=1e-5, atol=1e-5)
    assert np.allclose(np.asarray(probs).sum(axis=-1), 1.0, atol=1e-5)

    # larger, non-multiple-of-256 batch: exercises the balanced 2-tile grid (tm=152, b_pad=304)
    xl = jax.random.normal(k_x, (300, input_size), dtype=jnp.float32)
    probs_l = jax.block_until_ready(policy_network_forward(xl, padded, out_size=output_size))
    np.testing.assert_allclose(
        np.asarray(probs_l), np.asarray(reference_forward(xl, params)), rtol=1e-5, atol=1e-5
    )

    # TODO(synk): act()'s Categorical sampling / log_prob is host-side RL glue, not part of
    # the forward pass; it is intentionally not implemented in the kernel.
    print("KERNEL_OK")
</pallas_src>

<mosaic_0001>
module attributes {stable_mosaic.version = 11 : i64} {
  func.func @policy_mlp_kernel(%arg0: i32, %arg1: memref<8x32xf32, #tpu.memory_space<vmem>>, %arg2: memref<32x128xf32, #tpu.memory_space<vmem>>, %arg3: memref<1x128xf32, #tpu.memory_space<vmem>>, %arg4: memref<128x128xf32, #tpu.memory_space<vmem>>, %arg5: memref<1x128xf32, #tpu.memory_space<vmem>>, %arg6: memref<128x128xf32, #tpu.memory_space<vmem>>, %arg7: memref<1x128xf32, #tpu.memory_space<vmem>>, %arg8: memref<8x128xf32, #tpu.memory_space<vmem>>) attributes {dimension_semantics = [#tpu.dimension_semantics<parallel>], iteration_bounds = array<i64: 1>, scalar_prefetch = 0 : i64, scratch_operands = 0 : i64, tpu.core_type = #tpu.core_type<tc>, window_params = [{transform_indices = @transform_0, window_bounds = array<i64: 8, 32>}, {pipeline_mode = #tpu.pipeline_mode<synchronous>, transform_indices = @transform_1, window_bounds = array<i64: 32, 128>}, {pipeline_mode = #tpu.pipeline_mode<synchronous>, transform_indices = @transform_2, window_bounds = array<i64: 1, 128>}, {pipeline_mode = #tpu.pipeline_mode<synchronous>, transform_indices = @transform_3, window_bounds = array<i64: 128, 128>}, {pipeline_mode = #tpu.pipeline_mode<synchronous>, transform_indices = @transform_4, window_bounds = array<i64: 1, 128>}, {pipeline_mode = #tpu.pipeline_mode<synchronous>, transform_indices = @transform_5, window_bounds = array<i64: 128, 128>}, {pipeline_mode = #tpu.pipeline_mode<synchronous>, transform_indices = @transform_6, window_bounds = array<i64: 1, 128>}, {transform_indices = @transform_7, window_bounds = array<i64: 8, 128>}]} {
    %c0 = arith.constant 0 : index
    %c0_0 = arith.constant 0 : index
    %0 = vector.load %arg1[%c0, %c0_0] : memref<8x32xf32, #tpu.memory_space<vmem>>, vector<8x32xf32>
    %c0_1 = arith.constant 0 : index
    %c0_2 = arith.constant 0 : index
    %1 = vector.load %arg2[%c0_1, %c0_2] : memref<32x128xf32, #tpu.memory_space<vmem>>, vector<32x128xf32>
    %cst = arith.constant dense<0.000000e+00> : vector<8x128xf32>
    %2 = tpu.matmul %0, %1, %cst {dimension_numbers = #tpu.dot_dimension_numbers<[1], [0], [0], [1], [0, 0, 1, 1], [], []>} : vector<8x32xf32>, vector<32x128xf32>, vector<8x128xf32> -> vector<8x128xf32>
    %c0_3 = arith.constant 0 : index
    %c0_4 = arith.constant 0 : index
    %3 = vector.load %arg3[%c0_3, %c0_4] : memref<1x128xf32, #tpu.memory_space<vmem>>, vector<1x128xf32>
    %4 = vector.broadcast %3 : vector<1x128xf32> to vector<8x128xf32>
    %5 = arith.addf %2, %4 : vector<8x128xf32>
    %cst_5 = arith.constant 0.000000e+00 : f32
    %6 = vector.broadcast %cst_5 : f32 to vector<8x128xf32>
    %7 = arith.maximumf %5, %6 : vector<8x128xf32>
    %c0_6 = arith.constant 0 : index
    %c0_7 = arith.constant 0 : index
    %8 = vector.load %arg4[%c0_6, %c0_7] : memref<128x128xf32, #tpu.memory_space<vmem>>, vector<128x128xf32>
    %cst_8 = arith.constant dense<0.000000e+00> : vector<8x128xf32>
    %9 = tpu.matmul %7, %8, %cst_8 {dimension_numbers = #tpu.dot_dimension_numbers<[1], [0], [0], [1], [0, 0, 1, 1], [], []>} : vector<8x128xf32>, vector<128x128xf32>, vector<8x128xf32> -> vector<8x128xf32>
    %c0_9 = arith.constant 0 : index
    %c0_10 = arith.constant 0 : index
    %10 = vector.load %arg5[%c0_9, %c0_10] : memref<1x128xf32, #tpu.memory_space<vmem>>, vector<1x128xf32>
    %11 = vector.broadcast %10 : vector<1x128xf32> to vector<8x128xf32>
    %12 = arith.addf %9, %11 : vector<8x128xf32>
    %cst_11 = arith.constant 0.000000e+00 : f32
    %13 = vector.broadcast %cst_11 : f32 to vector<8x128xf32>
    %14 = arith.maximumf %12, %13 : vector<8x128xf32>
    %c0_12 = arith.constant 0 : index
    %c0_13 = arith.constant 0 : index
    %15 = vector.load %arg6[%c0_12, %c0_13] : memref<128x128xf32, #tpu.memory_space<vmem>>, vector<128x128xf32>
    %cst_14 = arith.constant dense<0.000000e+00> : vector<8x128xf32>
    %16 = tpu.matmul %14, %15, %cst_14 {dimension_numbers = #tpu.dot_dimension_numbers<[1], [0], [0], [1], [0, 0, 1, 1], [], []>} : vector<8x128xf32>, vector<128x128xf32>, vector<8x128xf32> -> vector<8x128xf32>
    %c0_15 = arith.constant 0 : index
    %c0_16 = arith.constant 0 : index
    %17 = vector.load %arg7[%c0_15, %c0_16] : memref<1x128xf32, #tpu.memory_space<vmem>>, vector<1x128xf32>
    %18 = vector.broadcast %17 : vector<1x128xf32> to vector<8x128xf32>
    %19 = arith.addf %16, %18 : vector<8x128xf32>
    %cst_17 = arith.constant dense<0xFF800000> : vector<8xf32>
    %20 = vector.multi_reduction <maximumf>, %19, %cst_17 [1] : vector<8x128xf32> to vector<8xf32>
    %21 = vector.shape_cast %20 : vector<8xf32> to vector<8x1xf32>
    %22 = vector.broadcast %21 : vector<8x1xf32> to vector<8x128xf32>
    %23 = arith.subf %19, %22 : vector<8x128xf32>
    %24 = math.exp %23 : vector<8x128xf32>
    %cst_18 = arith.constant dense<0.000000e+00> : vector<8xf32>
    %25 = vector.multi_reduction <add>, %24, %cst_18 [1] : vector<8x128xf32> to vector<8xf32>
    %26 = vector.shape_cast %25 : vector<8xf32> to vector<8x1xf32>
    %27 = vector.broadcast %26 : vector<8x1xf32> to vector<8x128xf32>
    %28 = arith.divf %24, %27 : vector<8x128xf32>
    %c0_19 = arith.constant 0 : index
    %c0_20 = arith.constant 0 : index
    %29 = vector.load %arg8[%c0_19, %c0_20] : memref<8x128xf32, #tpu.memory_space<vmem>>, vector<8x128xf32>
    tpu.vector_store %arg8[%c0_19, %c0_20], %28 {strides = array<i32>} : memref<8x128xf32, #tpu.memory_space<vmem>>, vector<8x128xf32>,
    return
  }
  func.func @transform_0(%arg0: i32) -> (i32, i32) {
    %c0_i32 = arith.constant 0 : i32
    %c0_i32_0 = arith.constant 0 : i32
    return %arg0, %c0_i32 : i32, i32
  }
  func.func @transform_1(%arg0: i32) -> (i32, i32) {
    %c0_i32 = arith.constant 0 : i32
    %c0_i32_0 = arith.constant 0 : i32
    %c0_i32_1 = arith.constant 0 : i32
    return %c0_i32, %c0_i32_0 : i32, i32
  }
  func.func @transform_2(%arg0: i32) -> (i32, i32) {
    %c0_i32 = arith.constant 0 : i32
    %c0_i32_0 = arith.constant 0 : i32
    %c0_i32_1 = arith.constant 0 : i32
    return %c0_i32, %c0_i32_0 : i32, i32
  }
  func.func @transform_3(%arg0: i32) -> (i32, i32) {
    %c0_i32 = arith.constant 0 : i32
    %c0_i32_0 = arith.constant 0 : i32
    %c0_i32_1 = arith.constant 0 : i32
    return %c0_i32, %c0_i32_0 : i32, i32
  }
  func.func @transform_4(%arg0: i32) -> (i32, i32) {
    %c0_i32 = arith.constant 0 : i32
    %c0_i32_0 = arith.constant 0 : i32
    %c0_i32_1 = arith.constant 0 : i32
    return %c0_i32, %c0_i32_0 : i32, i32
  }
  func.func @transform_5(%arg0: i32) -> (i32, i32) {
    %c0_i32 = arith.constant 0 : i32
    %c0_i32_0 = arith.constant 0 : i32
    %c0_i32_1 = arith.constant 0 : i32
    return %c0_i32, %c0_i32_0 : i32, i32
  }
  func.func @transform_6(%arg0: i32) -> (i32, i32) {
    %c0_i32 = arith.constant 0 : i32
    %c0_i32_0 = arith.constant 0 : i32
    %c0_i32_1 = arith.constant 0 : i32
    return %c0_i32, %c0_i32_0 : i32, i32
  }
  func.func @transform_7(%arg0: i32) -> (i32, i32) {
    %c0_i32 = arith.constant 0 : i32
    %c0_i32_0 = arith.constant 0 : i32
    return %arg0, %c0_i32 : i32, i32
  }
}

</mosaic_0001>

<bundles_post_ra>
// kernel: policy_network_forward.1
= control target key start
LH: loop header
LB: loop body
LE: loop exit
PB: predicated region body
PF: predicated region fallthrough
CT: control target
= control target key end

     0   :  { %12 = vsyncpa [#allocation3], 0  ;;  %s457_s0 = inlined_call_operand.hbm [shape: f32[8,32], index: 0, kind: input, shape index: {}]   ;;  %s458_s1 = inlined_call_operand.hbm [shape: f32[32,128], index: 1, kind: input, shape index: {}]   ;;  %s459_s2 = inlined_call_operand.hbm [shape: f32[1,128], index: 2, kind: input, shape index: {}]   ;;  %s460_s3 = inlined_call_operand.hbm [shape: f32[128,128], index: 3, kind: input, shape index: {}]   ;;  %s461_s4 = inlined_call_operand.vmem [shape: f32[1,128], index: 4, kind: input, shape index: {}]   ;;  %s462_s5 = inlined_call_operand.hbm [shape: f32[128,128], index: 5, kind: input, shape index: {}]   ;;  %s463_s6 = inlined_call_operand.vmem [shape: f32[1,128], index: 6, kind: input, shape index: {}]   ;;  %s464_s7 = inlined_call_operand.vmem [shape: f32[8,128], index: 7, kind: output, shape index: {}]  }
   0x1   :  { %13 = vsyncpa [#allocation5], 0  ;;  %s30_s26 = sshll.u32 %s458_s1, 4  ;;  %s31_s26 = int_to_ptr.hbm [resolvable:$true] %s30_s26 }
   0x2   :  { %14 = vsyncpa [#allocation8], 0  ;;  %s386_s27 = smov [#allocation4]   ;;  %s54_s8 = sshll.u32 %s460_s3, 4  ;;  %s55_s8 = int_to_ptr.hbm [resolvable:$true] %s54_s8 }
   0x3   :  { %s32_s28 = sshll.u32 %s386_s27, 4  ;;  %s387_s9 = smov 128   ;;  %s33_s28 = int_to_ptr.vmem [resolvable:$true] %s32_s28 }
   0x4   :  { %s388_s10 = smov 8   ;;  %s389_s11 = smov [#allocation7]  }
   0x5   :  { %38 = dma.hbm_to_vmem [thread:$0]  %s31_s26, 512, %s33_s28, [#allocation5], %s387_s9, %s387_s9, %s388_s10  }
   0x6   :  { %s56_s12 = sshll.u32 %s389_s11, 4  ;;  %s20_s15 = sshll.u32 %s457_s0, 4  ;;  %s57_s12 = int_to_ptr.vmem [resolvable:$true] %s56_s12  ;;  %s21_s15 = int_to_ptr.hbm [resolvable:$true] %s20_s15 }
   0x7   :  { %62 = dma.hbm_to_vmem [thread:$0]  %s55_s8, 2048, %s57_s12, [#allocation8], %s387_s9, %s387_s9, %s388_s10  }
   0x8   :  { %s44_s17 = sshll.u32 %s459_s2, 4  ;;  %s390_s18 = smov [#allocation2]   ;;  %s45_s17 = int_to_ptr.hbm [resolvable:$true] %s44_s17 }
   0x9   :  { %s22_s19 = sshll.u32 %s390_s18, 4  ;;  %s391_s3 = smov [#allocation6]   ;;  %s23_s19 = int_to_ptr.vmem [resolvable:$true] %s22_s19 }
   0xa   :  { %25 = dma.hbm_to_vmem [thread:$0]  %s21_s15, 128, %s23_s19, [#allocation3]  }
   0xb   :  { %s46_s20 = sshll.u32 %s391_s3, 4  ;;  %s69_s23 = sshll.u32 %s462_s5, 4  ;;  %s47_s20 = int_to_ptr.vmem [resolvable:$true] %s46_s20  ;;  %s70_s23 = int_to_ptr.hbm [resolvable:$true] %s69_s23 }
   0xc   :  { %49 = dma.hbm_to_vmem [thread:$0]  %s45_s17, 16, %s47_s20, [#allocation5]  }
   0xd   :  { %s392_s0 = smov [#allocation9]  }
   0xe   :  { %s71_s24 = sshll.u32 %s392_s0, 4  ;;  %s72_s24 = int_to_ptr.vmem [resolvable:$true] %s71_s24 }
   0xf   :  { %77 = dma.hbm_to_vmem [thread:$0]  %s70_s23, 2048, %s72_s24, [#allocation8], %s387_s9, %s387_s9, %s388_s10  }
  0x10   :  { %380 = dma.done.wait [#allocation3], 128  }
  0x11   :  { %381 = vsyncadd [#allocation3], 4294967168 }
  0x12   :  { %382 = dma.done.wait [#allocation5], 528  }
  0x13   :  { %383 = vsyncadd [#allocation5], 4294966768 }
  0x14   :  { %384 = dma.done.wait [#allocation8], 4096  }
  0x15   :  { %385 = vsyncadd [#allocation8], 4294963200  ;;  %v104_v0 = vld [vmem:[#allocation4 + $0x18] sm:$0xff]  ;;  %v103_v1 = vld [vmem:[#allocation4 + $0x10] sm:$0xff]  ;;  %vm109_vm0 = vcmask 261120  }
  0x16   :  { %125 = vmatpush.msra.mxu0 %v104_v0  ;;  %v149_v2 = vld [vmem:[#allocation7 + $0x78] sm:$0xff]  ;;  %v102_v3 = vld [vmem:[#allocation4 + $0x8] sm:$0xff]  ;;  %v148_v4 = vld [vmem:[#allocation7 + $0x70] sm:$0xff] }
  0x17   :  { %154 = vmatpush.msra.mxu1 %v149_v2  ;;  %v147_v5 = vld [vmem:[#allocation7 + $0x68] sm:$0xff]  ;;  %v101_v6 = vld [vmem:[#allocation4] sm:$0xff]  ;;  %v100_v7 = vld [vmem:[#allocation2] sm:$0xff] }
  0x18   :  { %126 = vmatpush.msra.mxu0 %v103_v1  ;;  %v146_v8 = vld [vmem:[#allocation7 + $0x60] sm:$0xff]  ;;  %v145_v9 = vld [vmem:[#allocation7 + $0x58] sm:$0xff]  ;;  %v144_v10 = vld [vmem:[#allocation7 + $0x50] sm:$0xff] }
  0x19   :  { %155 = vmatpush.msra.mxu1 %v148_v4  ;;  %v143_v11 = vld [vmem:[#allocation7 + $0x48] sm:$0xff]  ;;  %v142_v12 = vld [vmem:[#allocation7 + $0x40] sm:$0xff]  ;;  %v141_v13 = vld [vmem:[#allocation7 + $0x38] sm:$0xff] }
  0x1a   :  { %127 = vmatpush.msra.mxu0 %v102_v3  ;;  %v140_v14 = vld [vmem:[#allocation7 + $0x30] sm:$0xff]  ;;  %v139_v15 = vld [vmem:[#allocation7 + $0x28] sm:$0xff]  ;;  %v138_v16 = vld [vmem:[#allocation7 + $0x20] sm:$0xff] }
  0x1b   :  { %156 = vmatpush.msra.mxu1 %v147_v5  ;;  %v137_v17 = vld [vmem:[#allocation7 + $0x18] sm:$0xff]  ;;  %v136_v18 = vld [vmem:[#allocation7 + $0x10] sm:$0xff]  ;;  %v135_v19 = vld [vmem:[#allocation7 + $0x8] sm:$0xff] }
  0x1c   :  { %128 = vmatpush.msra.mxu0 %v101_v6  ;;  %v134_v20 = vld [vmem:[#allocation7] sm:$0xff]  ;;  %v190_v21 = vld [vmem:[#allocation9 + $0x78] sm:$0xff]  ;;  %v189_v22 = vld [vmem:[#allocation9 + $0x70] sm:$0xff] }
  0x1d   :  { %245 = vmatmul.msk.f32.vlgmr.msra.gmra.mxu0 %vm109_vm0, %v100_v7  ;;  %157 = vmatpush.msra.mxu1 %v146_v8  ;;  %v188_v23 = vld [vmem:[#allocation9 + $0x68] sm:$0xff]  ;;  %v187_v24 = vld [vmem:[#allocation9 + $0x60] sm:$0xff]  ;;  %v186_v25 = vld [vmem:[#allocation9 + $0x58] sm:$0xff] }
  0x1e   :  { %195 = vmatpush.msra.mxu2 %v190_v21  ;;  %v185_v26 = vld [vmem:[#allocation9 + $0x50] sm:$0xff]  ;;  %v184_v27 = vld [vmem:[#allocation9 + $0x48] sm:$0xff]  ;;  %v183_v28 = vld [vmem:[#allocation9 + $0x40] sm:$0xff] }
  0x1f   :  { %158 = vmatpush.msra.mxu1 %v145_v9  ;;  %v182_v29 = vld [vmem:[#allocation9 + $0x38] sm:$0xff]  ;;  %v181_v30 = vld [vmem:[#allocation9 + $0x30] sm:$0xff]  ;;  %v180_v31 = vld [vmem:[#allocation9 + $0x28] sm:$0xff] }
  0x20   :  { %196 = vmatpush.msra.mxu2 %v189_v22  ;;  %v179_v32 = vld [vmem:[#allocation9 + $0x20] sm:$0xff]  ;;  %v178_v33 = vld [vmem:[#allocation9 + $0x18] sm:$0xff]  ;;  %v177_v38 = vld [vmem:[#allocation9 + $0x10] sm:$0xff] }
  0x21   :  { %159 = vmatpush.msra.mxu1 %v144_v10  ;;  %v253_v34 = vld [vmem:[#allocation6] ss:$0 sm:$0xff]  ;;  %v176_v39 = vld [vmem:[#allocation9 + $0x8] sm:$0xff]  ;;  %v175_v40 = vld [vmem:[#allocation9] sm:$0xff] }
  0x22   :  { %197 = vmatpush.msra.mxu2 %v188_v23  ;;  %v254_v41 = vld [vmem:[%s461_s4] ss:$0 sm:$0xff] }
  0x23   :  { %160 = vmatpush.msra.mxu1 %v143_v11  ;;  %v255_v45 = vld [vmem:[%s463_s6] ss:$0 sm:$0xff] }
  0x24   :  { %198 = vmatpush.msra.mxu2 %v187_v24 }
  0x25   :  { %161 = vmatpush.msra.mxu1 %v142_v12 }
  0x26   :  { %199 = vmatpush.msra.mxu2 %v186_v25 }
  0x27   :  { %162 = vmatpush.msra.mxu1 %v141_v13 }
  0x28   :  { %200 = vmatpush.msra.mxu2 %v185_v26 }
  0x29   :  { %163 = vmatpush.msra.mxu1 %v140_v14 }
  0x2a   :  { %201 = vmatpush.msra.mxu2 %v184_v27 }
  0x2b   :  { %164 = vmatpush.msra.mxu1 %v139_v15 }
  0x2c   :  { %202 = vmatpush.msra.mxu2 %v183_v28 }
  0x2d   :  { %165 = vmatpush.msra.mxu1 %v138_v16 }
  0x2e   :  { %203 = vmatpush.msra.mxu2 %v182_v29 }
  0x2f   :  { %166 = vmatpush.msra.mxu1 %v137_v17 }
  0x30   :  { %204 = vmatpush.msra.mxu2 %v181_v30 }
  0x31   :  { %167 = vmatpush.msra.mxu1 %v136_v18 }
  0x32   :  { %205 = vmatpush.msra.mxu2 %v180_v31 }
  0x33   :  { %168 = vmatpush.msra.mxu1 %v135_v19 }
  0x34   :  { %206 = vmatpush.msra.mxu2 %v179_v32 }
  0x35   :  { %169 = vmatpush.msra.mxu1 %v134_v20 }
  0x36   :  { %207 = vmatpush.msra.mxu2 %v178_v33 }
  0x38   :  { %208 = vmatpush.msra.mxu2 %v177_v38 }
  0x3a   :  { %209 = vmatpush.msra.mxu2 %v176_v39 }
  0x3c   :  { %210 = vmatpush.msra.mxu2 %v175_v40 }
  0x9a   :  { %v130_v35 = vpop.f32.mrf.mxu0 }
  0x9b   :  { %v131_v36 = vadd.f32 %v253_v34, %v130_v35 }
  0x9d   :  { %v133_v37 = vmax.f32 %v131_v36, 0.0 }
  0x9f   :  { %170 = vmatmul.f32.vlgmr.msra.gmra.mxu1 %v133_v37 }
 0x11c   :  { %v171_v42 = vpop.f32.mrf.mxu1 }
 0x11d   :  { %v172_v43 = vadd.f32 %v254_v41, %v171_v42 }
 0x11f   :  { %v174_v44 = vmax.f32 %v172_v43, 0.0 }
 0x121   :  { %211 = vmatmul.f32.vlgmr.msra.gmra.mxu2 %v174_v44 }
 0x1a4   :  { %v212_v46 = vpop.f32.mrf.mxu2 }
 0x1a5   :  { %v213_v47 = vadd.f32 %v255_v45, %v212_v46 }
 0x1a7   :  { %215 = vmax.xlane.f32.xlu0 %v213_v47 }
 0x21a   :  { %v216_v48 = vpop.xlane.xlu0 %215 }
 0x21b   :  { %v217_v49 = vsub.f32 %v213_v47, %v216_v48 }
 0x21d   :  { %v218_v50 = vmul.f32 1.442695, %v217_v49 }
 0x21f   :  { %256 = vpow2.f32 %v218_v50 }
 0x225   :  { %v257_v51 = vpop.eup %256 }
 0x226   :  { %220 = vadd.xlane.f32.xlu0 %v257_v51 }
 0x299   :  { %v221_v52 = vpop.xlane.xlu0 %220 }
 0x29a   :  { %258 = vrcp.f32 %v221_v52  ;;  %v233_v56 = vand.u32 2147483648, %v221_v52  ;;  %v231_v58 = vand.u32 2147483647, %v221_v52  ;;  %vm227_vm2 = vweird.f32 %v221_v52 }
 0x29c   :  { %v234_v60 = vor.u32 1.1754944e-38, %v233_v56  ;;  %vm232_vm4 = vcmp.eq.f32.partialorder %v231_v58, 8.507059e+37 }
 0x2a0   :  { %v259_v53 = vpop.eup %258 }
 0x2a1   :  { %v223_v54 = vmul.f32 %v259_v53, %v221_v52  ;;  %vm228_vm1 = vweird.f32 %v259_v53 }
 0x2a2   :  { %vm229_vm3 = vmor %vm227_vm2, %vm228_vm1 }
 0x2a3   :  { %v224_v55 = vsub.f32 1.0, %v223_v54 }
 0x2a5   :  { %v225_v57 = vmul.f32 %v259_v53, %v224_v55 }
 0x2a7   :  { %v226_v59 = vadd.f32 %v259_v53, %v225_v57 }
 0x2a9   :  { %v230_v61 = vsel %vm229_vm3, %v259_v53, %v226_v59 }
 0x2aa   :  { %v235_v62 = vsel %vm232_vm4, %v234_v60, %v230_v61 }
 0x2ab   :  { %v236_v63 = vmul.f32 %v257_v51, %v235_v62 }
 0x2ad   :  { %237 = vst [vmem:[%s464_s7] sm:$0xff] %v236_v63 }
 0x2ae   :  { %242 = vsyncpa [#allocation3], 1 }
 0x2af   :  { %243 = vsyncpa [#allocation5], 1 }
 0x2b0   :  { %244 = vsyncpa [#allocation8], 1 }

</bundles_post_ra>
